<compile_context>
chip_gen: v7x
topology: tpu7x:2x2x1
jax: 0.10.0
libtpu: 0.0.40
codegen_flags: <defaults>
</compile_context>

<pallas_src>
import jax
import jax.numpy as jnp
from jax.experimental import pallas as pl
from jax.experimental.pallas import tpu as pltpu


# ---------------------------------------------------------------------------
# Packed-parameter layout inside a single (8, 16) f32 slab (transposed,
# feature-major so weight columns broadcast along lanes inside the kernel):
#   W1^T (5,4) -> rows 0:5, cols 0:4     b1 (5,) -> rows 0:5, col 4
#   W2^T (4,5) -> rows 0:4, cols 5:10    b2 (4,) -> rows 0:4, col 10
#   W3^T (3,4) -> rows 0:3, cols 11:15   b3 (3,) -> rows 0:3, col 15
# ---------------------------------------------------------------------------
_PARAM_SHAPE = (8, 16)


def mlp_kernel(x_ref, p_ref, o_ref):
    x = x_ref[...]          # (4, TB) f32: features on sublanes, batch on lanes
    p = p_ref[...]          # (8, 16) f32 packed params (VMEM-resident)

    def linear(h, k, n, wcol, bcol):
        """h: (k, TB) -> (n, TB) = W^T @ h + b, via VPU broadcast-MACs."""
        acc = p[0:n, wcol:wcol + 1] * h[0:1, :]                   # (n,1)*(1,TB)
        for i in range(1, k):
            acc = acc + p[0:n, wcol + i:wcol + i + 1] * h[i:i + 1, :]
        return acc + p[0:n, bcol:bcol + 1]                        # + bias (n,1)

    def sigmoid_eup(h):
        # exp on EUP; approx reciprocal (vrcp) keeps the VALU slots free
        return pl.reciprocal(1.0 + jnp.exp(-h), approx=True)

    h1 = sigmoid_eup(linear(x, 4, 5, 0, 4))     # layer 1: 4 -> 5, sigmoid
    h2 = sigmoid_eup(linear(h1, 5, 4, 5, 10))   # layer 2: 5 -> 4, sigmoid
    y = linear(h2, 4, 3, 11, 15)                # layer 3: 4 -> 3 (no act.)
    o_ref[...] = y.astype(o_ref.dtype)


def _round_up(a, b):
    return (a + b - 1) // b * b


def pack_params(w1, b1, w2, b2, w3, b3):
    """Pack all weights/biases (given as [in,out] / [out]) into (8,16) f32."""
    p = jnp.zeros(_PARAM_SHAPE, jnp.float32)
    p = p.at[0:5, 0:4].set(w1.T.astype(jnp.float32))      # W1^T (5,4)
    p = p.at[0:5, 4].set(b1.reshape(-1).astype(jnp.float32))
    p = p.at[0:4, 5:10].set(w2.T.astype(jnp.float32))     # W2^T (4,5)
    p = p.at[0:4, 10].set(b2.reshape(-1).astype(jnp.float32))
    p = p.at[0:3, 11:15].set(w3.T.astype(jnp.float32))    # W3^T (3,4)
    p = p.at[0:3, 15].set(b3.reshape(-1).astype(jnp.float32))
    return p


def mlp_forward(x, packed_params, *, block_b=1024):
    """x: (..., 4) -> (..., 3). Batch goes on the lane axis, tiled by TB."""
    lead = x.shape[:-1]
    x2 = x.reshape(-1, 4)
    B = x2.shape[0]

    block_b = _round_up(block_b, 128)
    tb = min(block_b, _round_up(B, 128))          # batch tile, multiple of 128
    Bp = _round_up(B, tb)

    xT = x2.T                                      # (4, B): lane-dense layout
    if Bp != B:
        xT = jnp.pad(xT, ((0, 0), (0, Bp - B)))    # zero-pad ragged batch tail
    grid = (Bp // tb,)

    outT = pl.pallas_call(
        mlp_kernel,
        out_shape=jax.ShapeDtypeStruct((3, Bp), x.dtype),
        grid=grid,
        in_specs=[
            # batch-tiled activations, lane-dense: pipelined over the grid
            pl.BlockSpec((4, tb), lambda i: (0, i)),
            # packed params: constant block index -> stays resident in VMEM
            pl.BlockSpec(_PARAM_SHAPE, lambda i: (0, 0)),
        ],
        out_specs=pl.BlockSpec((3, tb), lambda i: (0, i)),
        compiler_params=pltpu.CompilerParams(
            dimension_semantics=("parallel",),     # megacore sharding
        ),
    )(xT, packed_params)

    return outT[:, :B].T.reshape(*lead, 3)


def init_params(key):
    # Deterministic synthetic init matching nn.Linear shapes (stored here as
    # [in, out] so the reference computes x @ W + b): [4,5], [5,4], [4,3].
    k1, k2, k3, k4, k5, k6 = jax.random.split(key, 6)
    w1 = jax.random.uniform(k1, (4, 5), jnp.float32, -0.5, 0.5)
    b1 = jax.random.uniform(k2, (5,), jnp.float32, -0.5, 0.5)
    w2 = jax.random.uniform(k3, (5, 4), jnp.float32, -0.5, 0.5)
    b2 = jax.random.uniform(k4, (4,), jnp.float32, -0.5, 0.5)
    w3 = jax.random.uniform(k5, (4, 3), jnp.float32, -0.5, 0.5)
    b3 = jax.random.uniform(k6, (3,), jnp.float32, -0.5, 0.5)
    return w1, b1, w2, b2, w3, b3


def mlp_reference(x, w1, b1, w2, b2, w3, b3):
    h1 = jax.nn.sigmoid(x @ w1 + b1)
    h2 = jax.nn.sigmoid(h1 @ w2 + b2)
    return h2 @ w3 + b3


if __name__ == "__main__":
    key = jax.random.PRNGKey(0)
    kx, kp = jax.random.split(key)

    batch = 500                                     # ragged: pads to 512 = 4 tiles
    x = jax.random.normal(kx, (batch, 4), dtype=jnp.float32)
    w1, b1, w2, b2, w3, b3 = init_params(kp)
    packed = pack_params(w1, b1, w2, b2, w3, b3)

    out = mlp_forward(x, packed, block_b=128)       # 4 grid steps of TB=128
    out = jax.block_until_ready(out)

    # correctness check vs plain-JAX reference (tolerance relaxed slightly for
    # the approx EUP reciprocal inside the in-kernel sigmoid)
    ref = mlp_reference(x, w1, b1, w2, b2, w3, b3)
    assert out.shape == (batch, 3)
    assert jnp.allclose(out, ref, atol=2e-2, rtol=2e-2), (
        f"mismatch vs reference, max abs err = {jnp.max(jnp.abs(out - ref))}")

    print("KERNEL_OK")
</pallas_src>

<mosaic_0001>
module attributes {stable_mosaic.version = 11 : i64} {
  func.func @mlp_kernel(%arg0: i32, %arg1: memref<4x128xf32, #tpu.memory_space<vmem>>, %arg2: memref<8x16xf32, #tpu.memory_space<vmem>>, %arg3: memref<3x128xf32, #tpu.memory_space<vmem>>) attributes {dimension_semantics = [#tpu.dimension_semantics<parallel>], iteration_bounds = array<i64: 4>, scalar_prefetch = 0 : i64, scratch_operands = 0 : i64, tpu.core_type = #tpu.core_type<tc>, window_params = [{transform_indices = @transform_0, window_bounds = array<i64: 4, 128>}, {pipeline_mode = #tpu.pipeline_mode<synchronous>, transform_indices = @transform_1, window_bounds = array<i64: 8, 16>}, {transform_indices = @transform_2, window_bounds = array<i64: 3, 128>}]} {
    %c0 = arith.constant 0 : index
    %c0_0 = arith.constant 0 : index
    %0 = vector.load %arg1[%c0, %c0_0] : memref<4x128xf32, #tpu.memory_space<vmem>>, vector<4x128xf32>
    %c0_1 = arith.constant 0 : index
    %c0_2 = arith.constant 0 : index
    %1 = vector.load %arg2[%c0_1, %c0_2] : memref<8x16xf32, #tpu.memory_space<vmem>>, vector<8x16xf32>
    %2 = vector.extract_strided_slice %1 {offsets = [0, 0], sizes = [5, 1], strides = [1, 1]} : vector<8x16xf32> to vector<5x1xf32>
    %3 = vector.extract_strided_slice %0 {offsets = [0, 0], sizes = [1, 128], strides = [1, 1]} : vector<4x128xf32> to vector<1x128xf32>
    %4 = vector.broadcast %2 : vector<5x1xf32> to vector<5x128xf32>
    %5 = vector.broadcast %3 : vector<1x128xf32> to vector<5x128xf32>
    %6 = arith.mulf %4, %5 : vector<5x128xf32>
    %7 = vector.extract_strided_slice %1 {offsets = [0, 1], sizes = [5, 1], strides = [1, 1]} : vector<8x16xf32> to vector<5x1xf32>
    %8 = vector.extract_strided_slice %0 {offsets = [1, 0], sizes = [1, 128], strides = [1, 1]} : vector<4x128xf32> to vector<1x128xf32>
    %9 = vector.broadcast %7 : vector<5x1xf32> to vector<5x128xf32>
    %10 = vector.broadcast %8 : vector<1x128xf32> to vector<5x128xf32>
    %11 = arith.mulf %9, %10 : vector<5x128xf32>
    %12 = arith.addf %6, %11 : vector<5x128xf32>
    %13 = vector.extract_strided_slice %1 {offsets = [0, 2], sizes = [5, 1], strides = [1, 1]} : vector<8x16xf32> to vector<5x1xf32>
    %14 = vector.extract_strided_slice %0 {offsets = [2, 0], sizes = [1, 128], strides = [1, 1]} : vector<4x128xf32> to vector<1x128xf32>
    %15 = vector.broadcast %13 : vector<5x1xf32> to vector<5x128xf32>
    %16 = vector.broadcast %14 : vector<1x128xf32> to vector<5x128xf32>
    %17 = arith.mulf %15, %16 : vector<5x128xf32>
    %18 = arith.addf %12, %17 : vector<5x128xf32>
    %19 = vector.extract_strided_slice %1 {offsets = [0, 3], sizes = [5, 1], strides = [1, 1]} : vector<8x16xf32> to vector<5x1xf32>
    %20 = vector.extract_strided_slice %0 {offsets = [3, 0], sizes = [1, 128], strides = [1, 1]} : vector<4x128xf32> to vector<1x128xf32>
    %21 = vector.broadcast %19 : vector<5x1xf32> to vector<5x128xf32>
    %22 = vector.broadcast %20 : vector<1x128xf32> to vector<5x128xf32>
    %23 = arith.mulf %21, %22 : vector<5x128xf32>
    %24 = arith.addf %18, %23 : vector<5x128xf32>
    %25 = vector.extract_strided_slice %1 {offsets = [0, 4], sizes = [5, 1], strides = [1, 1]} : vector<8x16xf32> to vector<5x1xf32>
    %26 = vector.broadcast %25 : vector<5x1xf32> to vector<5x128xf32>
    %27 = arith.addf %24, %26 : vector<5x128xf32>
    %cst = arith.constant 0.000000e+00 : f32
    %28 = vector.broadcast %cst : f32 to vector<5x128xf32>
    %29 = arith.subf %28, %27 : vector<5x128xf32>
    %30 = math.exp %29 : vector<5x128xf32>
    %cst_3 = arith.constant 1.000000e+00 : f32
    %31 = vector.broadcast %cst_3 : f32 to vector<5x128xf32>
    %32 = arith.addf %31, %30 : vector<5x128xf32>
    %33 = tpu.reciprocal %32 {approx = true} : vector<5x128xf32> -> vector<5x128xf32>
    %34 = vector.extract_strided_slice %1 {offsets = [0, 5], sizes = [4, 1], strides = [1, 1]} : vector<8x16xf32> to vector<4x1xf32>
    %35 = vector.extract_strided_slice %33 {offsets = [0, 0], sizes = [1, 128], strides = [1, 1]} : vector<5x128xf32> to vector<1x128xf32>
    %36 = vector.broadcast %34 : vector<4x1xf32> to vector<4x128xf32>
    %37 = vector.broadcast %35 : vector<1x128xf32> to vector<4x128xf32>
    %38 = arith.mulf %36, %37 : vector<4x128xf32>
    %39 = vector.extract_strided_slice %1 {offsets = [0, 6], sizes = [4, 1], strides = [1, 1]} : vector<8x16xf32> to vector<4x1xf32>
    %40 = vector.extract_strided_slice %33 {offsets = [1, 0], sizes = [1, 128], strides = [1, 1]} : vector<5x128xf32> to vector<1x128xf32>
    %41 = vector.broadcast %39 : vector<4x1xf32> to vector<4x128xf32>
    %42 = vector.broadcast %40 : vector<1x128xf32> to vector<4x128xf32>
    %43 = arith.mulf %41, %42 : vector<4x128xf32>
    %44 = arith.addf %38, %43 : vector<4x128xf32>
    %45 = vector.extract_strided_slice %1 {offsets = [0, 7], sizes = [4, 1], strides = [1, 1]} : vector<8x16xf32> to vector<4x1xf32>
    %46 = vector.extract_strided_slice %33 {offsets = [2, 0], sizes = [1, 128], strides = [1, 1]} : vector<5x128xf32> to vector<1x128xf32>
    %47 = vector.broadcast %45 : vector<4x1xf32> to vector<4x128xf32>
    %48 = vector.broadcast %46 : vector<1x128xf32> to vector<4x128xf32>
    %49 = arith.mulf %47, %48 : vector<4x128xf32>
    %50 = arith.addf %44, %49 : vector<4x128xf32>
    %51 = vector.extract_strided_slice %1 {offsets = [0, 8], sizes = [4, 1], strides = [1, 1]} : vector<8x16xf32> to vector<4x1xf32>
    %52 = vector.extract_strided_slice %33 {offsets = [3, 0], sizes = [1, 128], strides = [1, 1]} : vector<5x128xf32> to vector<1x128xf32>
    %53 = vector.broadcast %51 : vector<4x1xf32> to vector<4x128xf32>
    %54 = vector.broadcast %52 : vector<1x128xf32> to vector<4x128xf32>
    %55 = arith.mulf %53, %54 : vector<4x128xf32>
    %56 = arith.addf %50, %55 : vector<4x128xf32>
    %57 = vector.extract_strided_slice %1 {offsets = [0, 9], sizes = [4, 1], strides = [1, 1]} : vector<8x16xf32> to vector<4x1xf32>
    %58 = vector.extract_strided_slice %33 {offsets = [4, 0], sizes = [1, 128], strides = [1, 1]} : vector<5x128xf32> to vector<1x128xf32>
    %59 = vector.broadcast %57 : vector<4x1xf32> to vector<4x128xf32>
    %60 = vector.broadcast %58 : vector<1x128xf32> to vector<4x128xf32>
    %61 = arith.mulf %59, %60 : vector<4x128xf32>
    %62 = arith.addf %56, %61 : vector<4x128xf32>
    %63 = vector.extract_strided_slice %1 {offsets = [0, 10], sizes = [4, 1], strides = [1, 1]} : vector<8x16xf32> to vector<4x1xf32>
    %64 = vector.broadcast %63 : vector<4x1xf32> to vector<4x128xf32>
    %65 = arith.addf %62, %64 : vector<4x128xf32>
    %cst_4 = arith.constant 0.000000e+00 : f32
    %66 = vector.broadcast %cst_4 : f32 to vector<4x128xf32>
    %67 = arith.subf %66, %65 : vector<4x128xf32>
    %68 = math.exp %67 : vector<4x128xf32>
    %cst_5 = arith.constant 1.000000e+00 : f32
    %69 = vector.broadcast %cst_5 : f32 to vector<4x128xf32>
    %70 = arith.addf %69, %68 : vector<4x128xf32>
    %71 = tpu.reciprocal %70 {approx = true} : vector<4x128xf32> -> vector<4x128xf32>
    %72 = vector.extract_strided_slice %1 {offsets = [0, 11], sizes = [3, 1], strides = [1, 1]} : vector<8x16xf32> to vector<3x1xf32>
    %73 = vector.extract_strided_slice %71 {offsets = [0, 0], sizes = [1, 128], strides = [1, 1]} : vector<4x128xf32> to vector<1x128xf32>
    %74 = vector.broadcast %72 : vector<3x1xf32> to vector<3x128xf32>
    %75 = vector.broadcast %73 : vector<1x128xf32> to vector<3x128xf32>
    %76 = arith.mulf %74, %75 : vector<3x128xf32>
    %77 = vector.extract_strided_slice %1 {offsets = [0, 12], sizes = [3, 1], strides = [1, 1]} : vector<8x16xf32> to vector<3x1xf32>
    %78 = vector.extract_strided_slice %71 {offsets = [1, 0], sizes = [1, 128], strides = [1, 1]} : vector<4x128xf32> to vector<1x128xf32>
    %79 = vector.broadcast %77 : vector<3x1xf32> to vector<3x128xf32>
    %80 = vector.broadcast %78 : vector<1x128xf32> to vector<3x128xf32>
    %81 = arith.mulf %79, %80 : vector<3x128xf32>
    %82 = arith.addf %76, %81 : vector<3x128xf32>
    %83 = vector.extract_strided_slice %1 {offsets = [0, 13], sizes = [3, 1], strides = [1, 1]} : vector<8x16xf32> to vector<3x1xf32>
    %84 = vector.extract_strided_slice %71 {offsets = [2, 0], sizes = [1, 128], strides = [1, 1]} : vector<4x128xf32> to vector<1x128xf32>
    %85 = vector.broadcast %83 : vector<3x1xf32> to vector<3x128xf32>
    %86 = vector.broadcast %84 : vector<1x128xf32> to vector<3x128xf32>
    %87 = arith.mulf %85, %86 : vector<3x128xf32>
    %88 = arith.addf %82, %87 : vector<3x128xf32>
    %89 = vector.extract_strided_slice %1 {offsets = [0, 14], sizes = [3, 1], strides = [1, 1]} : vector<8x16xf32> to vector<3x1xf32>
    %90 = vector.extract_strided_slice %71 {offsets = [3, 0], sizes = [1, 128], strides = [1, 1]} : vector<4x128xf32> to vector<1x128xf32>
    %91 = vector.broadcast %89 : vector<3x1xf32> to vector<3x128xf32>
    %92 = vector.broadcast %90 : vector<1x128xf32> to vector<3x128xf32>
    %93 = arith.mulf %91, %92 : vector<3x128xf32>
    %94 = arith.addf %88, %93 : vector<3x128xf32>
    %95 = vector.extract_strided_slice %1 {offsets = [0, 15], sizes = [3, 1], strides = [1, 1]} : vector<8x16xf32> to vector<3x1xf32>
    %96 = vector.broadcast %95 : vector<3x1xf32> to vector<3x128xf32>
    %97 = arith.addf %94, %96 : vector<3x128xf32>
    %c0_6 = arith.constant 0 : index
    %c0_7 = arith.constant 0 : index
    %98 = vector.load %arg3[%c0_6, %c0_7] : memref<3x128xf32, #tpu.memory_space<vmem>>, vector<3x128xf32>
    tpu.vector_store %arg3[%c0_6, %c0_7], %97 {strides = array<i32>} : memref<3x128xf32, #tpu.memory_space<vmem>>, vector<3x128xf32>,
    return
  }
  func.func @transform_0(%arg0: i32) -> (i32, i32) {
    %c0_i32 = arith.constant 0 : i32
    %c0_i32_0 = arith.constant 0 : i32
    return %c0_i32, %arg0 : i32, i32
  }
  func.func @transform_1(%arg0: i32) -> (i32, i32) {
    %c0_i32 = arith.constant 0 : i32
    %c0_i32_0 = arith.constant 0 : i32
    %c0_i32_1 = arith.constant 0 : i32
    return %c0_i32, %c0_i32_0 : i32, i32
  }
  func.func @transform_2(%arg0: i32) -> (i32, i32) {
    %c0_i32 = arith.constant 0 : i32
    %c0_i32_0 = arith.constant 0 : i32
    return %c0_i32, %arg0 : i32, i32
  }
}

</mosaic_0001>

<bundles_post_ra>
// kernel: tpu_custom_call.1
= control target key start
LH: loop header
LB: loop body
LE: loop exit
PB: predicated region body
PF: predicated region fallthrough
CT: control target
= control target key end

     0   :  { %7 = vsyncpa [#allocation3], 0  ;;  %s924_s0 = inlined_call_operand.hbm [shape: f32[4,512], index: 0, kind: input, shape index: {}]   ;;  %s925_s1 = inlined_call_operand.hbm [shape: f32[8,16], index: 1, kind: input, shape index: {}]   ;;  %s926_s2 = inlined_call_operand.hbm [shape: f32[3,512], index: 2, kind: output, shape index: {}]  }
   0x1   :  { %9 = vsyncpa [#allocation3 + $0x1], 0 }
   0x2   :  { %10 = vsyncpa [#allocation6], 0 }
   0x3   :  { %11 = vsyncpa [#allocation4], 0 }
   0x4   :  { %13 = vsyncpa [#allocation4 + $0x1], 0  ;;  %s698_s9 = smov 0   ;;  %s700_s10 = smov 0  }
   0x5   :  { %s702_s11 = smov 0   ;;  %s704_s12 = smov 0  }
   0x6 LB: > { %s719_s13 = sadd.s32 4294967295, %s662_s12   ;;  %s422_s14 = sadd.s32 4294967294, %s662_s12   ;;  %s662_s12 = sphi %s704_s12, %s949_s12   ;;  %s658_s11 = sphi %s702_s11, %s948_s11   ;;  %s654_s10 = sphi %s700_s10, %s947_s10   ;;  %s650_s9 = sphi %s698_s9, %s946_s9  }
   0x7   : > { %p39_p0 = scmp.ne.s32.totalorder %s654_s10, %s650_s9  ;;  %p927_p1 = scmp.eq.s32.totalorder %s719_s13, 0 }
   0x8   : > { %p90_p3 = scmp.eq.s32.totalorder %s422_s14, 3  ;;  %p423_p5 = scmp.ge.s32.totalorder %s662_s12, 1 }
   0x9   : > { %p728_p4 = por %p927_p1, %p39_p0  ;;  %p97_p7 = scmp.lt.s32.totalorder %s662_s12, 5 }
   0xa   : > { %p733_p6 = por %p90_p3, %p39_p0  ;;  %s664_s18 = smov [#allocation5]  }
   0xb   : > { %s930_s15 = scalar_select %p728_p4, 1, 0 }
   0xc   : > { %s931_s16 = scalar_select %p733_p6, 1, 0 }
   0xd   : > { %p738_p8 = pnand %p423_p5, %p97_p7  ;;  %s110_s19 = sshll.u32 %s664_s18, 4  ;;  %s111_s19 = int_to_ptr.vmem [resolvable:$true] %s110_s19 }
   0xe   : > { %s745_s20 = sadd.s32 1, %s662_s12   ;;  %s26_s24 = sadd.s32 1, %s658_s11 }
   0xf   : > { %s932_s17 = scalar_select %p738_p8, 1, 0 }
  0x10   : > { %p444_p9 = pneg %p738_p8  ;;  %s23_s22 = ssub.s32 %s662_s12, %s745_s20 }
  0x11   : > { %p755_p11 = scmp.eq.s32.totalorder %s23_s22, 0  ;;  %s534_s27 = scalar_lea.hbm %s925_s1, 128 }
  0x12   : > { %p749_p10 = pnand %p444_p9, %p927_p1  ;;  %p535_p13 = scmp.ne.s32.totalorder %s925_s1, %s534_s27 }
  0x13   : > { %s934_s23 = scalar_select %p755_p11, 1, 0 }
  0x14   : > { %p536_p0 = pneg %p749_p10  ;;  %p541_p7 = scmp.lt.u32.totalorder %s534_s27, %s925_s1 }
  0x16   : > { %p537_p3 = pnand %p536_p0, %p535_p13 }
  0x18   : > { %p538_p5 = pneg %p537_p3 }
  0x1a   : > { %p543_p9 = pnand %p541_p7, %p538_p5 }
  0x1c   : > { %546 = shalt.err (!%p543_p9)
}
  0x1d   : > { %s547_s4 = scalar_lea.vmem %s111_s19, 128  ;;  %p555_p6 = scmp.lt.s32.totalorder %s111_s19, %s111_s19 }
  0x1e   : > { %p548_p1 = scmp.ne.s32.totalorder %s111_s19, %s547_s4  ;;  %p556_p4 = scmp.lt.s32.totalorder %s547_s4, %s547_s4 }
  0x20   : > { %p550_p2 = pnand %p548_p1, %p536_p0  ;;  %p557_p8 = por %p556_p4, %p555_p6 }
  0x22   : > { %p551_p12 = pneg %p550_p2 }
  0x24   : > { %p558_p11 = pnand %p557_p8, %p551_p12 }
  0x26   : > { %561 = shalt.err (!%p558_p11)
}
  0x27   : > { %447 = dma.hbm_to_vmem [thread:$0]  (!%p749_p10), %s925_s1, 128, %s111_s19, [#allocation6]  }
  0x28   : > { %p935_p1 = scmp.ne.s32.totalorder %s934_s23, 0  ;;  %p34_p2 = scmp.eq.s32.totalorder %s662_s12, 0 }
  0x29   : > { %p936_p4 = scmp.ne.s32.totalorder %s658_s11, %s654_s10  ;;  %p937_p6 = scmp.eq.s32.totalorder %s719_s13, 3 }
  0x2a   : > { %s781_s7 = scalar_select %p935_p1, %s658_s11, %s26_s24  }
  0x2b   : > { %p789_p8 = por %p937_p6, %p936_p4  ;;  %p457_p11 = scmp.lt.s32.totalorder %s662_s12, 4 }
  0x2c   : > { %s121_s14 = sand.u32 1, %s658_s11   ;;  %p939_p12 = pmov %p936_p4 }
  0x2d   : > { %s426_s18 = sshll.u32 %s121_s14, 2  ;;  %s427_s21 = sshll.u32 %s662_s12, 6 }
  0x2e   : > { %p35_p13 = por %p34_p2, %p939_p12  ;;  %s802_s19 = scalar_lea.hbm %s924_s0, %s427_s21 }
  0x2f   : > { %s125_s23 = scalar_lea.vmem [#allocation2], %s426_s18  ;;  %s122_s27 = scalar_lea.sflag [#allocation3], %s121_s14 }
  0x30   : > { %s132_s24 = sshll.u32 %s125_s23, 4  ;;  %p804_p10 = pnand %p457_p11, %p35_p13  ;;  %s808_s24 = int_to_ptr.vmem [resolvable:$true] %s132_s24 }
  0x31   : > { %s562_s28 = scalar_lea.hbm %s802_s19, 64  ;;  %s567_s3 = scalar_lea.hbm %s924_s0, 256 }
  0x32   : > { %p563_p0 = scmp.ne.s32.totalorder %s802_s19, %s562_s28  ;;  %p564_p3 = pneg %p804_p10 }
  0x33   : > { %p568_p9 = scmp.lt.u32.totalorder %s802_s19, %s924_s0  ;;  %p569_p1 = scmp.lt.u32.totalorder %s567_s3, %s562_s28 }
  0x34   : > { %p565_p5 = pnand %p564_p3, %p563_p0  ;;  %p571_p4 = scmp.lt.u32.totalorder %s562_s28, %s802_s19 }
  0x35   : > { %p570_p2 = por %p569_p1, %p568_p9 }
  0x36   : > { %p566_p7 = pneg %p565_p5 }
  0x37   : > { %p572_p6 = por %p571_p4, %p570_p2 }
  0x39   : > { %p573_p11 = pnand %p572_p6, %p566_p7 }
  0x3b   : > { %576 = shalt.err (!%p573_p11)
}
  0x3c   : > { %s577_s6 = scalar_lea.vmem %s808_s24, 64  ;;  %s665_s14 = smov [#allocation2]  }
  0x3d   : > { %p578_p12 = scmp.ne.s32.totalorder %s808_s24, %s577_s6  ;;  %s582_s18 = sshll.u32 %s665_s14, 4  ;;  %s583_s18 = int_to_ptr.vmem [resolvable:$false] %s582_s18 }
  0x3e   : > { %s584_s21 = scalar_lea.vmem %s583_s18, 128  ;;  %p585_p5 = scmp.lt.s32.totalorder %s808_s24, %s583_s18 }
  0x3f   : > { %p580_p13 = pnand %p578_p12, %p564_p3  ;;  %p586_p9 = scmp.lt.s32.totalorder %s584_s21, %s577_s6 }
  0x41   : > { %p581_p0 = pneg %p580_p13  ;;  %p587_p1 = por %p586_p9, %p585_p5 }
  0x43   : > { %p588_p2 = pnand %p587_p1, %p581_p0 }
  0x45   : > { %591 = shalt.err (!%p588_p2)
}
  0x46   : > { %451 = dma.hbm_to_vmem [thread:$0]  (!%p804_p10), %s802_s19, 64, %s808_s24, %s122_s27  }
  0x47   : > { %p941_p7 = scmp.ne.s32.totalorder %s932_s17, 0 }
  0x48   : > { %s838_s22 = sand.u32 (!%p941_p7), 1, %s654_s10   ;;  %p942_p3 = scmp.ne.s32.totalorder (!%p941_p7), %s930_s15, 0 }
  0x49   : > { %141 = sbr.rel (%p941_p7) target bundleno = 325 (0x145), region = 28  ;;  %s429_s25 = sshll.u32 (!%p941_p7), %s838_s22, 2 }
  0x4a   : > { %s144_s23 = scalar_lea.sflag (!%p941_p7), [#allocation3], %s838_s22  ;;  %s844_s28 = scalar_lea.vmem (!%p941_p7), [#allocation2], %s429_s25 }
  0x50   : > { %637 = dma.done.wait (%p942_p3), %s144_s23, 64  }
  0x51   : > { %639 = vsyncadd (%p942_p3), %s144_s23, 4294967232  ;;  %p943_p10 = scmp.eq.s32.totalorder %s719_s13, 0 }
  0x53   : > { %641 = dma.done.wait (%p943_p10), [#allocation6], 128   ;;  %p944_p4 = pmov %p943_p10 }
  0x54   : > { %v666_v0 = vmov 0   ;;  %v667_v1 = vmov 2   ;;  %v173_v2 = vld [vmem:[#allocation5] sm:$0xff]  ;;  %v668_v3 = vmov 1   ;;  %v669_v4 = vmov 3   ;;  %s433_s15 = sshll.u32 %s719_s13, 6 }
  0x55   : > { %643 = vsyncadd (%p944_p4), [#allocation6], 4294967168  ;;  %509 = vset.pattern.permute.xlu0 %v666_v0  ;;  %511 = vset.pattern.permute.xlu1 %v667_v1  ;;  %v670_v5 = vmov 4   ;;  %v671_v6 = vmov 5   ;;  %v672_v7 = vmov 6   ;;  %v673_v8 = vmov 8   ;;  %s881_s27 = scalar_lea.hbm %s926_s2, %s433_s15 }
  0x56   : > { %176 = vperm.xlu0 %509, %v173_v2   ;;  %195 = vperm.xlu1 %511, %v173_v2   ;;  %v674_v9 = vmov 7   ;;  %v675_v10 = vmov 11   ;;  %v676_v11 = vmov 9   ;;  %v677_v12 = vmov 14   ;;  %v172_v21 = vld [vmem:[%s844_s28] sm:$0xf] }
  0x57   : > { %v678_v13 = vmov 10   ;;  %v679_v14 = vmov 15   ;;  %v680_v15 = vmov 12   ;;  %v681_v16 = vmov 13   ;;  %s171_s17 = scalar_lea.vmem [#allocation7], %s429_s25  ;;  %s329_s29 = scalar_lea.sflag [#allocation4], %s838_s22 }
  0x58   : > { %v179_v17 = vlaneseq  ;;  %s342_s19 = sshll.u32 %s171_s17, 4  ;;  %s682_s13 = smov [#allocation7]   ;;  %s883_s19 = int_to_ptr.vmem [resolvable:$true] %s342_s19 }
  0x59   : > { %s592_s30 = scalar_lea.vmem %s883_s19, 64  ;;  %s596_s3 = sshll.u32 %s682_s13, 4  ;;  %s597_s3 = int_to_ptr.vmem [resolvable:$false] %s596_s3 }
  0x5a   : > { %510 = vset.pattern.permute.xlu0 %v668_v3  ;;  %512 = vset.pattern.permute.xlu1 %v669_v4  ;;  %v180_v18 = vshrl.u32 %v179_v17, 7  ;;  %p593_p6 = scmp.ne.s32.totalorder %s883_s19, %s592_s30  ;;  %s598_s4 = scalar_lea.vmem %s597_s3, 128 }
  0x5b   : > { %185 = vperm.xlu0 %510, %v173_v2   ;;  %205 = vperm.xlu1 %512, %v173_v2   ;;  %p599_p13 = scmp.lt.s32.totalorder %s883_s19, %s597_s3  ;;  %p600_p0 = scmp.lt.s32.totalorder %s598_s4, %s592_s30 }
  0x5c   : > { %v854_v19 = vsub.s32 0, %v180_v18  ;;  %v856_v20 = vsub.s32 1, %v180_v18  ;;  %v859_v23 = vsub.s32 2, %v180_v18  ;;  %v861_v25 = vsub.s32 3, %v180_v18  ;;  %p594_p11 = pnand %p593_p6, %p789_p8 }
  0x5d   : > { %v269_v52 = vsub.s32 4, %v180_v18  ;;  %p601_p5 = por %p600_p0, %p599_p13 }
  0x5e   : > { %v182_v26 = vrot.slane %v172_v21, %v854_v19  ;;  %v191_v27 = vrot.slane %v172_v21, %v856_v20  ;;  %v201_v28 = vrot.slane %v172_v21, %v859_v23  ;;  %v211_v29 = vrot.slane %v172_v21, %v861_v25  ;;  %p595_p12 = pneg %p594_p11 }
  0x5f   : > { %513 = vset.pattern.permute.xlu1 %v670_v5  ;;  %514 = vset.pattern.permute.xlu0 %v671_v6 }
  0x60   : > { %215 = vperm.xlu1 %513, %v173_v2   ;;  %225 = vperm.xlu0 %514, %v173_v2   ;;  %p602_p9 = pnand %p601_p5, %p595_p12 }
  0x64   : > { %515 = vset.pattern.permute.xlu1 %v672_v7  ;;  %517 = vset.pattern.permute.xlu0 %v673_v8 }
  0x65   : > { %234 = vperm.xlu1 %515, %v173_v2   ;;  %254 = vperm.xlu0 %517, %v173_v2  }
  0x69   : > { %516 = vset.pattern.permute.xlu1 %v674_v9  ;;  %520 = vset.pattern.permute.xlu0 %v675_v10 }
  0x6a   : > { %244 = vperm.xlu1 %516, %v173_v2   ;;  %284 = vperm.xlu0 %520, %v173_v2  }
  0x6e   : > { %518 = vset.pattern.permute.xlu1 %v676_v11  ;;  %523 = vset.pattern.permute.xlu0 %v677_v12 }
  0x6f   : > { %264 = vperm.xlu1 %518, %v173_v2   ;;  %313 = vperm.xlu0 %523, %v173_v2  }
  0x73   : > { %519 = vset.pattern.permute.xlu1 %v678_v13  ;;  %525 = vset.pattern.permute.xlu0 %v679_v14 }
  0x74   : > { %274 = vperm.xlu1 %519, %v173_v2  }
  0x78   : > { %521 = vset.pattern.permute.xlu1 %v680_v15 }
  0x79   : > { %293 = vperm.xlu1 %521, %v173_v2  }
  0x7d   : > { %522 = vset.pattern.permute.xlu1 %v681_v16 }
  0x7e   : > { %303 = vperm.xlu1 %522, %v173_v2  }
  0x82   : > { %524 = vset.pattern.permute.xlu1 %v679_v14 }
  0x83   : > { %323 = vperm.xlu1 %524, %v173_v2  }
  0xd5   : > { %v177_v22 = vpop.permute.xlu0 %176  ;;  %v196_v24 = vpop.permute.xlu1 %195 }
  0xd6   : > { %v183_v32 = vmul.f32 %v182_v26, %v177_v22  ;;  %v202_v34 = vmul.f32 %v201_v28, %v196_v24 }
  0xda   : > { %v186_v30 = vpop.permute.xlu0 %185  ;;  %v206_v31 = vpop.permute.xlu1 %205 }
  0xdb   : > { %v192_v33 = vmul.f32 %v191_v27, %v186_v30  ;;  %v212_v36 = vmul.f32 %v211_v29, %v206_v31 }
  0xdd   : > { %v193_v35 = vadd.f32 %v192_v33, %v183_v32 }
  0xdf   : > { %v203_v37 = vadd.f32 %v202_v34, %v193_v35  ;;  %v216_v38 = vpop.permute.xlu1 %215  ;;  %v226_v46 = vpop.permute.xlu0 %225 }
  0xe1   : > { %v213_v39 = vadd.f32 %v212_v36, %v203_v37 }
  0xe3   : > { %v218_v40 = vadd.f32 %v216_v38, %v213_v39 }
  0xe4   : > { %v235_v45 = vpop.permute.xlu1 %234  ;;  %v255_v56 = vpop.permute.xlu0 %254 }
  0xe5   : > { %v219_v41 = vsub.f32 0.0, %v218_v40 }
  0xe7   : > { %v220_v42 = vmul.f32 1.442695, %v219_v41 }
  0xe9   : > { %526 = vpow2.f32 %v220_v42  ;;  %v245_v48 = vpop.permute.xlu1 %244  ;;  %v285_v9 = vpop.permute.xlu0 %284 }
  0xee   : > { %v265_v60 = vpop.permute.xlu1 %264  ;;  %v314_v18 = vpop.permute.xlu0 %313 }
  0xf3   : > { %v527_v43 = vpop.eup %526  ;;  %v275_v1 = vpop.permute.xlu1 %274 }
  0xf4   : > { %v222_v44 = vadd.f32 1.0, %v527_v43 }
  0xf6   : > { %528 = vrcp.f32 %v222_v44 }
  0xf8   : > { %v294_v8 = vpop.permute.xlu1 %293 }
  0xfd   : > { %v304_v14 = vpop.permute.xlu1 %303 }
 0x100   : > { %v529_v47 = vpop.eup %528 }
 0x101   : > { %v240_v49 = vrot.slane %v529_v47, %v856_v20  ;;  %v250_v50 = vrot.slane %v529_v47, %v859_v23  ;;  %v231_v51 = vrot.slane %v529_v47, %v854_v19  ;;  %v260_v55 = vrot.slane %v529_v47, %v861_v25 }
 0x102   : > { %v270_v59 = vrot.slane %v529_v47, %v269_v52  ;;  %v324_v27 = vpop.permute.xlu1 %323 }
 0x103   : > { %v241_v53 = vmul.f32 %v240_v49, %v235_v45  ;;  %v232_v54 = vmul.f32 %v231_v51, %v226_v46  ;;  %v251_v57 = vmul.f32 %v250_v50, %v245_v48  ;;  %v261_v62 = vmul.f32 %v260_v55, %v255_v56 }
 0x104   : > { %v271_v63 = vmul.f32 %v270_v59, %v265_v60 }
 0x105   : > { %v242_v58 = vadd.f32 %v241_v53, %v232_v54 }
 0x107   : > { %v252_v61 = vadd.f32 %v251_v57, %v242_v58 }
 0x109   : > { %v262_v0 = vadd.f32 %v261_v62, %v252_v61 }
 0x10b   : > { %v272_v2 = vadd.f32 %v271_v63, %v262_v0 }
 0x10d   : > { %v277_v3 = vadd.f32 %v275_v1, %v272_v2 }
 0x10f   : > { %v278_v4 = vsub.f32 0.0, %v277_v3 }
 0x111   : > { %v279_v5 = vmul.f32 1.442695, %v278_v4 }
 0x113   : > { %530 = vpow2.f32 %v279_v5 }
 0x11d   : > { %v531_v6 = vpop.eup %530 }
 0x11e   : > { %v281_v7 = vadd.f32 1.0, %v531_v6 }
 0x120   : > { %532 = vrcp.f32 %v281_v7 }
 0x12a   : > { %v533_v10 = vpop.eup %532 }
 0x12b   : > { %v299_v11 = vrot.slane %v533_v10, %v856_v20  ;;  %v290_v12 = vrot.slane %v533_v10, %v854_v19  ;;  %v309_v13 = vrot.slane %v533_v10, %v859_v23  ;;  %v319_v17 = vrot.slane %v533_v10, %v861_v25 }
 0x12d   : > { %v300_v15 = vmul.f32 %v299_v11, %v294_v8  ;;  %v291_v16 = vmul.f32 %v290_v12, %v285_v9  ;;  %v310_v22 = vmul.f32 %v309_v13, %v304_v14  ;;  %v320_v26 = vmul.f32 %v319_v17, %v314_v18 }
 0x12f   : > { %v301_v21 = vadd.f32 %v300_v15, %v291_v16 }
 0x131   : > { %v311_v24 = vadd.f32 %v310_v22, %v301_v21 }
 0x133   : > { %v321_v19 = vadd.f32 %v320_v26, %v311_v24 }
 0x135   : > { %v326_v20 = vadd.f32 %v324_v27, %v321_v19 }
 0x137   : > { %327 = vst [vmem:[%s171_s17] sm:$0x7] %v326_v20 }
 0x138   : > { %605 = shalt.err (!%p602_p9)
}
 0x139   : > { %s606_s5 = scalar_lea.hbm %s881_s27, 64  ;;  %s610_s18 = scalar_lea.hbm %s926_s2, 256 }
 0x13a   : > { %p607_p1 = scmp.ne.s32.totalorder %s881_s27, %s606_s5  ;;  %p611_p3 = scmp.lt.u32.totalorder %s881_s27, %s926_s2 }
 0x13b   : > { %p612_p10 = scmp.lt.u32.totalorder %s610_s18, %s606_s5  ;;  %p614_p6 = scmp.lt.u32.totalorder %s606_s5, %s881_s27 }
 0x13c   : > { %p608_p2 = pnand %p607_p1, %p789_p8 }
 0x13d   : > { %p613_p4 = por %p612_p10, %p611_p3 }
 0x13e   : > { %p609_p7 = pneg %p608_p2 }
 0x13f   : > { %p615_p11 = por %p614_p6, %p613_p4 }
 0x141   : > { %p616_p12 = pnand %p615_p11, %p609_p7 }
 0x143   : > { %619 = shalt.err (!%p616_p12)
}
 0x144   : > { %442 = dma.vmem_to_hbm [thread:$0]  (%p789_p8), %s883_s19, 64, %s881_s27, %s329_s29  }
 0x145 PF: > { %p459_p13 = scmp.ge.s32.totalorder %s662_s12, 2  ;;  %s354_s25 = sand.u32 1, %s650_s9  }
 0x146   : > { %p945_p0 = scmp.ne.s32.totalorder %s931_s16, 0  ;;  %s355_s23 = scalar_lea.sflag [#allocation4], %s354_s25 }
 0x148   : > { %p453_p5 = pnand %p459_p13, %p945_p0 }
 0x14a   : > { %645 = dma.done.wait (!%p453_p5), %s355_s23, 64  }
 0x14b   : > { %647 = vsyncadd (!%p453_p5), %s355_s23, 4294967232  ;;  %p16_p9 = scmp.ge.s32.totalorder %s745_s20, 6   ;;  %s946_s9 = smov %s654_s10 }
 0x14c   : > { %s947_s10 = smov %s658_s11  ;;  %s948_s11 = smov %s781_s7 }
 0x14d   : > { %s949_s12 = smov %s745_s20  ;;  %18 = sbr.rel (!%p16_p9) target bundleno = 6 (0x6), region = 77 }
 0x154   :  { %360 = vsyncpa [#allocation3], 1 }
 0x155   :  { %362 = vsyncpa [#allocation3 + $0x1], 1 }
 0x156   :  { %363 = vsyncpa [#allocation6], 1 }
 0x157   :  { %364 = vsyncpa [#allocation4], 1 }
 0x158   :  { %366 = vsyncpa [#allocation4 + $0x1], 1 }

</bundles_post_ra>
